<compile_context>
chip_gen: v5e
topology: v5e:2x2
jax: 0.10.0
libtpu: 0.0.40
codegen_flags: <defaults>
</compile_context>

<pallas_src>
import functools

import jax
import jax.numpy as jnp
from jax.experimental import pallas as pl
from jax.experimental.pallas import tpu as pltpu

LN_EPS = 1e-5


def _gating_compute(res, g, attn_ref, ln_w_ref, ln_b_ref, w_ref, b_ref,
                    out_ref, *, use_mxu):
    """LayerNorm(gate) -> 1x1-conv head mix -> (+attn) [Identity act] -> * res."""
    H, n, D = g.shape
    g32 = g.astype(jnp.float32)

    # One-pass LN statistics: two independent XLU reductions, no serial
    # dependency through a full-tile subtract.
    inv_d = 1.0 / D
    mean = jnp.sum(g32, axis=-1, keepdims=True) * inv_d
    ex2 = jnp.sum(g32 * g32, axis=-1, keepdims=True) * inv_d
    var = jnp.maximum(ex2 - mean * mean, 0.0)
    inv = jax.lax.rsqrt(var + LN_EPS)                               # EUP slot
    normed = (g32 - mean) * inv * ln_w_ref[...] + ln_b_ref[...]     # (H, n, D) f32

    # Elementwise-tail dtype: bf16 inputs keep the tail + store in bf16
    # (native VPU on v6e/v7x, halves store bytes); otherwise f32 (v5e-safe).
    cdt = res.dtype if res.dtype == jnp.bfloat16 else jnp.float32
    attn_v = attn_ref[0].astype(cdt)
    res_v = res.astype(cdt)

    if use_mxu:
        # Non-trivial head count: head mixing on the (otherwise idle) MXU.
        normed2d = normed.reshape(H, n * D)
        mixed2d = jnp.dot(w_ref[...], normed2d,
                          preferred_element_type=jnp.float32) + b_ref[...]
        mixed = mixed2d.reshape(H, n, D)
        out_ref[0] = ((mixed.astype(cdt) + attn_v) * res_v).astype(out_ref.dtype)
    else:
        # Tiny H: fully unrolled scalar(SMEM) x vector FMAs on the VPU; the
        # conv bias is folded into the first FMA (gate activation = Identity).
        for h in range(H):
            acc = w_ref[h, 0] * normed[0] + b_ref[h]
            for k in range(1, H):
                acc = acc + w_ref[h, k] * normed[k]
            out_ref[0, h] = ((acc.astype(cdt) + attn_v[h])
                             * res_v[h]).astype(out_ref.dtype)


def _gating_kernel_fused_x(x_ref, attn_ref, ln_w_ref, ln_b_ref, w_ref, b_ref,
                           out_ref, *, use_mxu):
    # x_ref: (1, H, n, 2*D); x is read from HBM once and split in-kernel.
    D = out_ref.shape[3]
    xv = x_ref[0]
    _gating_compute(xv[..., :D], xv[..., D:], attn_ref, ln_w_ref, ln_b_ref,
                    w_ref, b_ref, out_ref, use_mxu=use_mxu)


def _gating_kernel_split_x(res_ref, gate_ref, attn_ref, ln_w_ref, ln_b_ref,
                           w_ref, b_ref, out_ref, *, use_mxu):
    # x passed twice with lane-aligned half-blocks (D % 128 == 0): still one
    # logical HBM read of each half, and no in-kernel lane slice/relayout.
    _gating_compute(res_ref[0], gate_ref[0], attn_ref, ln_w_ref, ln_b_ref,
                    w_ref, b_ref, out_ref, use_mxu=use_mxu)


def gating_unit(x, attn, ln_w, ln_b, conv_w, conv_b, *,
                vmem_limit_bytes=40 * 1024 * 1024,
                target_tile_bytes=8 * 1024 * 1024):
    """x: (B, H, N, 2*D); attn: (B, H, N, D). Returns (B, H, N, D)."""
    B, H, N, D2 = x.shape
    D = D2 // 2

    use_mxu = H > 8                # VPU scalar-FMA mix for tiny H, MXU otherwise
    lane_split = (D % 128 == 0)    # lane-aligned half-blocks of x are legal

    # --- N tiling: largest block under a per-step byte budget, kept
    # sublane-aligned (multiple of 8) whenever it is a proper sub-block.
    itemsize = x.dtype.itemsize
    row_bytes = H * 4 * D * itemsize              # x(2D) + attn(D) + out(D) per row
    budget_rows = max(1, target_tile_bytes // max(1, row_bytes))
    if N <= 8:
        n_t = N
    else:
        n_t = min(N, int(budget_rows))
        n_t = max(8, (n_t // 8) * 8)
    num_n = pl.cdiv(N, n_t)

    ln_w2 = ln_w.reshape(1, D).astype(jnp.float32)
    ln_b2 = ln_b.reshape(1, D).astype(jnp.float32)
    conv_w32 = conv_w.reshape(H, H).astype(jnp.float32)

    attn_spec = pl.BlockSpec((1, H, n_t, D), lambda b, j: (b, 0, j, 0))
    out_spec = pl.BlockSpec((1, H, n_t, D), lambda b, j: (b, 0, j, 0))
    ln_spec = pl.BlockSpec((1, D), lambda b, j: (0, 0))

    if use_mxu:
        w_spec = pl.BlockSpec((H, H), lambda b, j: (0, 0))     # VMEM -> MXU operand
        b_spec = pl.BlockSpec((H, 1), lambda b, j: (0, 0))
        conv_b_arg = conv_b.reshape(H, 1).astype(jnp.float32)
    else:
        w_spec = pl.BlockSpec(memory_space=pltpu.MemorySpace.SMEM)
        b_spec = pl.BlockSpec(memory_space=pltpu.MemorySpace.SMEM)
        conv_b_arg = conv_b.reshape(H).astype(jnp.float32)

    if lane_split:
        kernel = functools.partial(_gating_kernel_split_x, use_mxu=use_mxu)
        x_specs = [pl.BlockSpec((1, H, n_t, D), lambda b, j: (b, 0, j, 0)),   # res half
                   pl.BlockSpec((1, H, n_t, D), lambda b, j: (b, 0, j, 1))]   # gate half
        x_args = (x, x)
    else:
        kernel = functools.partial(_gating_kernel_fused_x, use_mxu=use_mxu)
        x_specs = [pl.BlockSpec((1, H, n_t, 2 * D), lambda b, j: (b, 0, j, 0))]
        x_args = (x,)

    return pl.pallas_call(
        kernel,
        out_shape=jax.ShapeDtypeStruct((B, H, N, D), x.dtype),
        grid=(B, num_n),
        in_specs=x_specs + [attn_spec, ln_spec, ln_spec, w_spec, b_spec],
        out_specs=out_spec,
        compiler_params=pltpu.CompilerParams(
            dimension_semantics=("parallel", "parallel"),
            vmem_limit_bytes=vmem_limit_bytes),
    )(*x_args, attn, ln_w2, ln_b2, conv_w32, conv_b_arg)


def reference(x, attn, ln_w, ln_b, conv_w, conv_b):
    D = x.shape[-1] // 2
    res, gate = x[..., :D], x[..., D:]
    mean = gate.mean(-1, keepdims=True)
    var = ((gate - mean) ** 2).mean(-1, keepdims=True)
    normed = (gate - mean) / jnp.sqrt(var + LN_EPS) * ln_w + ln_b
    mixed = jnp.einsum("hk,bknd->bhnd", conv_w, normed) + conv_b[None, :, None, None]
    return (mixed + attn) * res


if __name__ == "__main__":
    B, HEADS, N, DIM = 2, 4, 16, 32

    key = jax.random.PRNGKey(0)
    kx, ka, klw, klb, kw, kb = jax.random.split(key, 6)

    x = jax.random.normal(kx, (B, HEADS, N, 2 * DIM), dtype=jnp.float32)
    attn = jax.random.normal(ka, (B, HEADS, N, DIM), dtype=jnp.float32)

    # Parameter shapes follow the module __init__:
    #   nn.LayerNorm(dim): weight (D,), bias (D,)
    #   nn.Conv2d(heads, heads, 1): weight (H, H, 1, 1) -> (H, H), bias (H,)
    # (The module's constant init weight=0 / bias=1 would make the conv trivial,
    #  so deterministic small random values are used to exercise the full path.)
    ln_w = 1.0 + 0.1 * jax.random.normal(klw, (DIM,), dtype=jnp.float32)
    ln_b = 0.1 * jax.random.normal(klb, (DIM,), dtype=jnp.float32)
    conv_w = 0.1 * jax.random.normal(kw, (HEADS, HEADS), dtype=jnp.float32)
    conv_b = 1.0 + 0.1 * jax.random.normal(kb, (HEADS,), dtype=jnp.float32)

    out = gating_unit(x, attn, ln_w, ln_b, conv_w, conv_b)
    out = jax.block_until_ready(out)

    ref = reference(x, attn, ln_w, ln_b, conv_w, conv_b)
    assert out.shape == (B, HEADS, N, DIM)
    assert jnp.allclose(out, ref, rtol=1e-5, atol=1e-4), float(jnp.max(jnp.abs(out - ref)))

    print("KERNEL_OK")
</pallas_src>

<mosaic_0001>
module attributes {stable_mosaic.version = 11 : i64} {
  func.func @_gating_kernel_fused_x(%arg0: i32, %arg1: i32, %arg2: memref<1x4x16x64xf32, #tpu.memory_space<vmem>>, %arg3: memref<1x4x16x32xf32, #tpu.memory_space<vmem>>, %arg4: memref<1x32xf32, #tpu.memory_space<vmem>>, %arg5: memref<1x32xf32, #tpu.memory_space<vmem>>, %arg6: memref<4x4xf32, #tpu.memory_space<smem>>, %arg7: memref<4xf32, #tpu.memory_space<smem>>, %arg8: memref<1x4x16x32xf32, #tpu.memory_space<vmem>>) attributes {dimension_semantics = [#tpu.dimension_semantics<parallel>, #tpu.dimension_semantics<parallel>], iteration_bounds = array<i64: 2, 1>, scalar_prefetch = 0 : i64, scratch_operands = 0 : i64, tpu.core_type = #tpu.core_type<tc>, window_params = [{transform_indices = @transform_0, window_bounds = array<i64: 1, 4, 16, 64>}, {transform_indices = @transform_1, window_bounds = array<i64: 1, 4, 16, 32>}, {pipeline_mode = #tpu.pipeline_mode<synchronous>, transform_indices = @transform_2, window_bounds = array<i64: 1, 32>}, {pipeline_mode = #tpu.pipeline_mode<synchronous>, transform_indices = @transform_3, window_bounds = array<i64: 1, 32>}, {transform_indices = @transform_4, window_bounds = array<i64: 4, 4>}, {transform_indices = @transform_5, window_bounds = array<i64: 4>}, {transform_indices = @transform_6, window_bounds = array<i64: 1, 4, 16, 32>}]} {
    %c0 = arith.constant 0 : index
    %c0_0 = arith.constant 0 : index
    %c0_1 = arith.constant 0 : index
    %c0_2 = arith.constant 0 : index
    %0 = vector.load %arg2[%c0, %c0_0, %c0_1, %c0_2] : memref<1x4x16x64xf32, #tpu.memory_space<vmem>>, vector<1x4x16x64xf32>
    %1 = vector.shape_cast %0 : vector<1x4x16x64xf32> to vector<4x16x64xf32>
    %2 = vector.extract_strided_slice %1 {offsets = [0, 0, 0], sizes = [4, 16, 32], strides = [1, 1, 1]} : vector<4x16x64xf32> to vector<4x16x32xf32>
    %3 = vector.extract_strided_slice %1 {offsets = [0, 0, 32], sizes = [4, 16, 32], strides = [1, 1, 1]} : vector<4x16x64xf32> to vector<4x16x32xf32>
    %cst = arith.constant dense<0.000000e+00> : vector<4x16xf32>
    %4 = vector.multi_reduction <add>, %3, %cst [2] : vector<4x16x32xf32> to vector<4x16xf32>
    %5 = vector.shape_cast %4 : vector<4x16xf32> to vector<4x16x1xf32>
    %cst_3 = arith.constant 3.125000e-02 : f32
    %6 = vector.broadcast %cst_3 : f32 to vector<4x16x1xf32>
    %7 = arith.mulf %5, %6 : vector<4x16x1xf32>
    %8 = arith.mulf %3, %3 : vector<4x16x32xf32>
    %cst_4 = arith.constant dense<0.000000e+00> : vector<4x16xf32>
    %9 = vector.multi_reduction <add>, %8, %cst_4 [2] : vector<4x16x32xf32> to vector<4x16xf32>
    %10 = vector.shape_cast %9 : vector<4x16xf32> to vector<4x16x1xf32>
    %cst_5 = arith.constant 3.125000e-02 : f32
    %11 = vector.broadcast %cst_5 : f32 to vector<4x16x1xf32>
    %12 = arith.mulf %10, %11 : vector<4x16x1xf32>
    %13 = arith.mulf %7, %7 : vector<4x16x1xf32>
    %14 = arith.subf %12, %13 : vector<4x16x1xf32>
    %cst_6 = arith.constant 0.000000e+00 : f32
    %15 = vector.broadcast %cst_6 : f32 to vector<4x16x1xf32>
    %16 = arith.maximumf %14, %15 : vector<4x16x1xf32>
    %cst_7 = arith.constant 9.99999974E-6 : f32
    %17 = vector.broadcast %cst_7 : f32 to vector<4x16x1xf32>
    %18 = arith.addf %16, %17 : vector<4x16x1xf32>
    %19 = math.rsqrt %18 : vector<4x16x1xf32>
    %20 = vector.broadcast %7 : vector<4x16x1xf32> to vector<4x16x32xf32>
    %21 = arith.subf %3, %20 : vector<4x16x32xf32>
    %22 = vector.broadcast %19 : vector<4x16x1xf32> to vector<4x16x32xf32>
    %23 = arith.mulf %21, %22 : vector<4x16x32xf32>
    %c0_8 = arith.constant 0 : index
    %c0_9 = arith.constant 0 : index
    %24 = vector.load %arg4[%c0_8, %c0_9] : memref<1x32xf32, #tpu.memory_space<vmem>>, vector<1x32xf32>
    %25 = vector.shape_cast %24 : vector<1x32xf32> to vector<1x1x32xf32>
    %26 = vector.broadcast %25 : vector<1x1x32xf32> to vector<4x16x32xf32>
    %27 = arith.mulf %23, %26 : vector<4x16x32xf32>
    %c0_10 = arith.constant 0 : index
    %c0_11 = arith.constant 0 : index
    %28 = vector.load %arg5[%c0_10, %c0_11] : memref<1x32xf32, #tpu.memory_space<vmem>>, vector<1x32xf32>
    %29 = vector.shape_cast %28 : vector<1x32xf32> to vector<1x1x32xf32>
    %30 = vector.broadcast %29 : vector<1x1x32xf32> to vector<4x16x32xf32>
    %31 = arith.addf %27, %30 : vector<4x16x32xf32>
    %c0_12 = arith.constant 0 : index
    %c0_13 = arith.constant 0 : index
    %c0_14 = arith.constant 0 : index
    %c0_15 = arith.constant 0 : index
    %32 = vector.load %arg3[%c0_12, %c0_13, %c0_14, %c0_15] : memref<1x4x16x32xf32, #tpu.memory_space<vmem>>, vector<1x4x16x32xf32>
    %33 = vector.shape_cast %32 : vector<1x4x16x32xf32> to vector<4x16x32xf32>
    %c0_16 = arith.constant 0 : index
    %c0_17 = arith.constant 0 : index
    %34 = memref.load %arg6[%c0_16, %c0_17] : memref<4x4xf32, #tpu.memory_space<smem>>
    %35 = vector.extract_strided_slice %31 {offsets = [0, 0, 0], sizes = [1, 16, 32], strides = [1, 1, 1]} : vector<4x16x32xf32> to vector<1x16x32xf32>
    %36 = vector.shape_cast %35 : vector<1x16x32xf32> to vector<16x32xf32>
    %37 = vector.broadcast %34 : f32 to vector<16x32xf32>
    %38 = arith.mulf %37, %36 : vector<16x32xf32>
    %c0_18 = arith.constant 0 : index
    %39 = memref.load %arg7[%c0_18] : memref<4xf32, #tpu.memory_space<smem>>
    %40 = vector.broadcast %39 : f32 to vector<16x32xf32>
    %41 = arith.addf %38, %40 : vector<16x32xf32>
    %c0_19 = arith.constant 0 : index
    %c1 = arith.constant 1 : index
    %42 = memref.load %arg6[%c0_19, %c1] : memref<4x4xf32, #tpu.memory_space<smem>>
    %43 = vector.extract_strided_slice %31 {offsets = [1, 0, 0], sizes = [1, 16, 32], strides = [1, 1, 1]} : vector<4x16x32xf32> to vector<1x16x32xf32>
    %44 = vector.shape_cast %43 : vector<1x16x32xf32> to vector<16x32xf32>
    %45 = vector.broadcast %42 : f32 to vector<16x32xf32>
    %46 = arith.mulf %45, %44 : vector<16x32xf32>
    %47 = arith.addf %41, %46 : vector<16x32xf32>
    %c0_20 = arith.constant 0 : index
    %c2 = arith.constant 2 : index
    %48 = memref.load %arg6[%c0_20, %c2] : memref<4x4xf32, #tpu.memory_space<smem>>
    %49 = vector.extract_strided_slice %31 {offsets = [2, 0, 0], sizes = [1, 16, 32], strides = [1, 1, 1]} : vector<4x16x32xf32> to vector<1x16x32xf32>
    %50 = vector.shape_cast %49 : vector<1x16x32xf32> to vector<16x32xf32>
    %51 = vector.broadcast %48 : f32 to vector<16x32xf32>
    %52 = arith.mulf %51, %50 : vector<16x32xf32>
    %53 = arith.addf %47, %52 : vector<16x32xf32>
    %c0_21 = arith.constant 0 : index
    %c3 = arith.constant 3 : index
    %54 = memref.load %arg6[%c0_21, %c3] : memref<4x4xf32, #tpu.memory_space<smem>>
    %55 = vector.extract_strided_slice %31 {offsets = [3, 0, 0], sizes = [1, 16, 32], strides = [1, 1, 1]} : vector<4x16x32xf32> to vector<1x16x32xf32>
    %56 = vector.shape_cast %55 : vector<1x16x32xf32> to vector<16x32xf32>
    %57 = vector.broadcast %54 : f32 to vector<16x32xf32>
    %58 = arith.mulf %57, %56 : vector<16x32xf32>
    %59 = arith.addf %53, %58 : vector<16x32xf32>
    %60 = vector.extract_strided_slice %33 {offsets = [0, 0, 0], sizes = [1, 16, 32], strides = [1, 1, 1]} : vector<4x16x32xf32> to vector<1x16x32xf32>
    %61 = vector.shape_cast %60 : vector<1x16x32xf32> to vector<16x32xf32>
    %62 = arith.addf %59, %61 : vector<16x32xf32>
    %63 = vector.extract_strided_slice %2 {offsets = [0, 0, 0], sizes = [1, 16, 32], strides = [1, 1, 1]} : vector<4x16x32xf32> to vector<1x16x32xf32>
    %64 = vector.shape_cast %63 : vector<1x16x32xf32> to vector<16x32xf32>
    %65 = arith.mulf %62, %64 : vector<16x32xf32>
    %c0_22 = arith.constant 0 : index
    %c0_23 = arith.constant 0 : index
    %c0_24 = arith.constant 0 : index
    %c0_25 = arith.constant 0 : index
    %66 = vector.load %arg8[%c0_22, %c0_23, %c0_24, %c0_25] : memref<1x4x16x32xf32, #tpu.memory_space<vmem>>, vector<1x1x16x32xf32>
    %67 = vector.shape_cast %66 : vector<1x1x16x32xf32> to vector<16x32xf32>
    %68 = vector.shape_cast %65 : vector<16x32xf32> to vector<1x1x16x32xf32>
    tpu.vector_store %arg8[%c0_22, %c0_23, %c0_24, %c0_25], %68 {strides = array<i32>} : memref<1x4x16x32xf32, #tpu.memory_space<vmem>>, vector<1x1x16x32xf32>,
    %c1_26 = arith.constant 1 : index
    %c0_27 = arith.constant 0 : index
    %69 = memref.load %arg6[%c1_26, %c0_27] : memref<4x4xf32, #tpu.memory_space<smem>>
    %70 = vector.extract_strided_slice %31 {offsets = [0, 0, 0], sizes = [1, 16, 32], strides = [1, 1, 1]} : vector<4x16x32xf32> to vector<1x16x32xf32>
    %71 = vector.shape_cast %70 : vector<1x16x32xf32> to vector<16x32xf32>
    %72 = vector.broadcast %69 : f32 to vector<16x32xf32>
    %73 = arith.mulf %72, %71 : vector<16x32xf32>
    %c1_28 = arith.constant 1 : index
    %74 = memref.load %arg7[%c1_28] : memref<4xf32, #tpu.memory_space<smem>>
    %75 = vector.broadcast %74 : f32 to vector<16x32xf32>
    %76 = arith.addf %73, %75 : vector<16x32xf32>
    %c1_29 = arith.constant 1 : index
    %c1_30 = arith.constant 1 : index
    %77 = memref.load %arg6[%c1_29, %c1_30] : memref<4x4xf32, #tpu.memory_space<smem>>
    %78 = vector.extract_strided_slice %31 {offsets = [1, 0, 0], sizes = [1, 16, 32], strides = [1, 1, 1]} : vector<4x16x32xf32> to vector<1x16x32xf32>
    %79 = vector.shape_cast %78 : vector<1x16x32xf32> to vector<16x32xf32>
    %80 = vector.broadcast %77 : f32 to vector<16x32xf32>
    %81 = arith.mulf %80, %79 : vector<16x32xf32>
    %82 = arith.addf %76, %81 : vector<16x32xf32>
    %c1_31 = arith.constant 1 : index
    %c2_32 = arith.constant 2 : index
    %83 = memref.load %arg6[%c1_31, %c2_32] : memref<4x4xf32, #tpu.memory_space<smem>>
    %84 = vector.extract_strided_slice %31 {offsets = [2, 0, 0], sizes = [1, 16, 32], strides = [1, 1, 1]} : vector<4x16x32xf32> to vector<1x16x32xf32>
    %85 = vector.shape_cast %84 : vector<1x16x32xf32> to vector<16x32xf32>
    %86 = vector.broadcast %83 : f32 to vector<16x32xf32>
    %87 = arith.mulf %86, %85 : vector<16x32xf32>
    %88 = arith.addf %82, %87 : vector<16x32xf32>
    %c1_33 = arith.constant 1 : index
    %c3_34 = arith.constant 3 : index
    %89 = memref.load %arg6[%c1_33, %c3_34] : memref<4x4xf32, #tpu.memory_space<smem>>
    %90 = vector.extract_strided_slice %31 {offsets = [3, 0, 0], sizes = [1, 16, 32], strides = [1, 1, 1]} : vector<4x16x32xf32> to vector<1x16x32xf32>
    %91 = vector.shape_cast %90 : vector<1x16x32xf32> to vector<16x32xf32>
    %92 = vector.broadcast %89 : f32 to vector<16x32xf32>
    %93 = arith.mulf %92, %91 : vector<16x32xf32>
    %94 = arith.addf %88, %93 : vector<16x32xf32>
    %95 = vector.extract_strided_slice %33 {offsets = [1, 0, 0], sizes = [1, 16, 32], strides = [1, 1, 1]} : vector<4x16x32xf32> to vector<1x16x32xf32>
    %96 = vector.shape_cast %95 : vector<1x16x32xf32> to vector<16x32xf32>
    %97 = arith.addf %94, %96 : vector<16x32xf32>
    %98 = vector.extract_strided_slice %2 {offsets = [1, 0, 0], sizes = [1, 16, 32], strides = [1, 1, 1]} : vector<4x16x32xf32> to vector<1x16x32xf32>
    %99 = vector.shape_cast %98 : vector<1x16x32xf32> to vector<16x32xf32>
    %100 = arith.mulf %97, %99 : vector<16x32xf32>
    %c0_35 = arith.constant 0 : index
    %c1_36 = arith.constant 1 : index
    %c0_37 = arith.constant 0 : index
    %c0_38 = arith.constant 0 : index
    %101 = vector.load %arg8[%c0_35, %c1_36, %c0_37, %c0_38] : memref<1x4x16x32xf32, #tpu.memory_space<vmem>>, vector<1x1x16x32xf32>
    %102 = vector.shape_cast %101 : vector<1x1x16x32xf32> to vector<16x32xf32>
    %103 = vector.shape_cast %100 : vector<16x32xf32> to vector<1x1x16x32xf32>
    tpu.vector_store %arg8[%c0_35, %c1_36, %c0_37, %c0_38], %103 {strides = array<i32>} : memref<1x4x16x32xf32, #tpu.memory_space<vmem>>, vector<1x1x16x32xf32>,
    %c2_39 = arith.constant 2 : index
    %c0_40 = arith.constant 0 : index
    %104 = memref.load %arg6[%c2_39, %c0_40] : memref<4x4xf32, #tpu.memory_space<smem>>
    %105 = vector.extract_strided_slice %31 {offsets = [0, 0, 0], sizes = [1, 16, 32], strides = [1, 1, 1]} : vector<4x16x32xf32> to vector<1x16x32xf32>
    %106 = vector.shape_cast %105 : vector<1x16x32xf32> to vector<16x32xf32>
    %107 = vector.broadcast %104 : f32 to vector<16x32xf32>
    %108 = arith.mulf %107, %106 : vector<16x32xf32>
    %c2_41 = arith.constant 2 : index
    %109 = memref.load %arg7[%c2_41] : memref<4xf32, #tpu.memory_space<smem>>
    %110 = vector.broadcast %109 : f32 to vector<16x32xf32>
    %111 = arith.addf %108, %110 : vector<16x32xf32>
    %c2_42 = arith.constant 2 : index
    %c1_43 = arith.constant 1 : index
    %112 = memref.load %arg6[%c2_42, %c1_43] : memref<4x4xf32, #tpu.memory_space<smem>>
    %113 = vector.extract_strided_slice %31 {offsets = [1, 0, 0], sizes = [1, 16, 32], strides = [1, 1, 1]} : vector<4x16x32xf32> to vector<1x16x32xf32>
    %114 = vector.shape_cast %113 : vector<1x16x32xf32> to vector<16x32xf32>
    %115 = vector.broadcast %112 : f32 to vector<16x32xf32>
    %116 = arith.mulf %115, %114 : vector<16x32xf32>
    %117 = arith.addf %111, %116 : vector<16x32xf32>
    %c2_44 = arith.constant 2 : index
    %c2_45 = arith.constant 2 : index
    %118 = memref.load %arg6[%c2_44, %c2_45] : memref<4x4xf32, #tpu.memory_space<smem>>
    %119 = vector.extract_strided_slice %31 {offsets = [2, 0, 0], sizes = [1, 16, 32], strides = [1, 1, 1]} : vector<4x16x32xf32> to vector<1x16x32xf32>
    %120 = vector.shape_cast %119 : vector<1x16x32xf32> to vector<16x32xf32>
    %121 = vector.broadcast %118 : f32 to vector<16x32xf32>
    %122 = arith.mulf %121, %120 : vector<16x32xf32>
    %123 = arith.addf %117, %122 : vector<16x32xf32>
    %c2_46 = arith.constant 2 : index
    %c3_47 = arith.constant 3 : index
    %124 = memref.load %arg6[%c2_46, %c3_47] : memref<4x4xf32, #tpu.memory_space<smem>>
    %125 = vector.extract_strided_slice %31 {offsets = [3, 0, 0], sizes = [1, 16, 32], strides = [1, 1, 1]} : vector<4x16x32xf32> to vector<1x16x32xf32>
    %126 = vector.shape_cast %125 : vector<1x16x32xf32> to vector<16x32xf32>
    %127 = vector.broadcast %124 : f32 to vector<16x32xf32>
    %128 = arith.mulf %127, %126 : vector<16x32xf32>
    %129 = arith.addf %123, %128 : vector<16x32xf32>
    %130 = vector.extract_strided_slice %33 {offsets = [2, 0, 0], sizes = [1, 16, 32], strides = [1, 1, 1]} : vector<4x16x32xf32> to vector<1x16x32xf32>
    %131 = vector.shape_cast %130 : vector<1x16x32xf32> to vector<16x32xf32>
    %132 = arith.addf %129, %131 : vector<16x32xf32>
    %133 = vector.extract_strided_slice %2 {offsets = [2, 0, 0], sizes = [1, 16, 32], strides = [1, 1, 1]} : vector<4x16x32xf32> to vector<1x16x32xf32>
    %134 = vector.shape_cast %133 : vector<1x16x32xf32> to vector<16x32xf32>
    %135 = arith.mulf %132, %134 : vector<16x32xf32>
    %c0_48 = arith.constant 0 : index
    %c2_49 = arith.constant 2 : index
    %c0_50 = arith.constant 0 : index
    %c0_51 = arith.constant 0 : index
    %136 = vector.load %arg8[%c0_48, %c2_49, %c0_50, %c0_51] : memref<1x4x16x32xf32, #tpu.memory_space<vmem>>, vector<1x1x16x32xf32>
    %137 = vector.shape_cast %136 : vector<1x1x16x32xf32> to vector<16x32xf32>
    %138 = vector.shape_cast %135 : vector<16x32xf32> to vector<1x1x16x32xf32>
    tpu.vector_store %arg8[%c0_48, %c2_49, %c0_50, %c0_51], %138 {strides = array<i32>} : memref<1x4x16x32xf32, #tpu.memory_space<vmem>>, vector<1x1x16x32xf32>,
    %c3_52 = arith.constant 3 : index
    %c0_53 = arith.constant 0 : index
    %139 = memref.load %arg6[%c3_52, %c0_53] : memref<4x4xf32, #tpu.memory_space<smem>>
    %140 = vector.extract_strided_slice %31 {offsets = [0, 0, 0], sizes = [1, 16, 32], strides = [1, 1, 1]} : vector<4x16x32xf32> to vector<1x16x32xf32>
    %141 = vector.shape_cast %140 : vector<1x16x32xf32> to vector<16x32xf32>
    %142 = vector.broadcast %139 : f32 to vector<16x32xf32>
    %143 = arith.mulf %142, %141 : vector<16x32xf32>
    %c3_54 = arith.constant 3 : index
    %144 = memref.load %arg7[%c3_54] : memref<4xf32, #tpu.memory_space<smem>>
    %145 = vector.broadcast %144 : f32 to vector<16x32xf32>
    %146 = arith.addf %143, %145 : vector<16x32xf32>
    %c3_55 = arith.constant 3 : index
    %c1_56 = arith.constant 1 : index
    %147 = memref.load %arg6[%c3_55, %c1_56] : memref<4x4xf32, #tpu.memory_space<smem>>
    %148 = vector.extract_strided_slice %31 {offsets = [1, 0, 0], sizes = [1, 16, 32], strides = [1, 1, 1]} : vector<4x16x32xf32> to vector<1x16x32xf32>
    %149 = vector.shape_cast %148 : vector<1x16x32xf32> to vector<16x32xf32>
    %150 = vector.broadcast %147 : f32 to vector<16x32xf32>
    %151 = arith.mulf %150, %149 : vector<16x32xf32>
    %152 = arith.addf %146, %151 : vector<16x32xf32>
    %c3_57 = arith.constant 3 : index
    %c2_58 = arith.constant 2 : index
    %153 = memref.load %arg6[%c3_57, %c2_58] : memref<4x4xf32, #tpu.memory_space<smem>>
    %154 = vector.extract_strided_slice %31 {offsets = [2, 0, 0], sizes = [1, 16, 32], strides = [1, 1, 1]} : vector<4x16x32xf32> to vector<1x16x32xf32>
    %155 = vector.shape_cast %154 : vector<1x16x32xf32> to vector<16x32xf32>
    %156 = vector.broadcast %153 : f32 to vector<16x32xf32>
    %157 = arith.mulf %156, %155 : vector<16x32xf32>
    %158 = arith.addf %152, %157 : vector<16x32xf32>
    %c3_59 = arith.constant 3 : index
    %c3_60 = arith.constant 3 : index
    %159 = memref.load %arg6[%c3_59, %c3_60] : memref<4x4xf32, #tpu.memory_space<smem>>
    %160 = vector.extract_strided_slice %31 {offsets = [3, 0, 0], sizes = [1, 16, 32], strides = [1, 1, 1]} : vector<4x16x32xf32> to vector<1x16x32xf32>
    %161 = vector.shape_cast %160 : vector<1x16x32xf32> to vector<16x32xf32>
    %162 = vector.broadcast %159 : f32 to vector<16x32xf32>
    %163 = arith.mulf %162, %161 : vector<16x32xf32>
    %164 = arith.addf %158, %163 : vector<16x32xf32>
    %165 = vector.extract_strided_slice %33 {offsets = [3, 0, 0], sizes = [1, 16, 32], strides = [1, 1, 1]} : vector<4x16x32xf32> to vector<1x16x32xf32>
    %166 = vector.shape_cast %165 : vector<1x16x32xf32> to vector<16x32xf32>
    %167 = arith.addf %164, %166 : vector<16x32xf32>
    %168 = vector.extract_strided_slice %2 {offsets = [3, 0, 0], sizes = [1, 16, 32], strides = [1, 1, 1]} : vector<4x16x32xf32> to vector<1x16x32xf32>
    %169 = vector.shape_cast %168 : vector<1x16x32xf32> to vector<16x32xf32>
    %170 = arith.mulf %167, %169 : vector<16x32xf32>
    %c0_61 = arith.constant 0 : index
    %c3_62 = arith.constant 3 : index
    %c0_63 = arith.constant 0 : index
    %c0_64 = arith.constant 0 : index
    %171 = vector.load %arg8[%c0_61, %c3_62, %c0_63, %c0_64] : memref<1x4x16x32xf32, #tpu.memory_space<vmem>>, vector<1x1x16x32xf32>
    %172 = vector.shape_cast %171 : vector<1x1x16x32xf32> to vector<16x32xf32>
    %173 = vector.shape_cast %170 : vector<16x32xf32> to vector<1x1x16x32xf32>
    tpu.vector_store %arg8[%c0_61, %c3_62, %c0_63, %c0_64], %173 {strides = array<i32>} : memref<1x4x16x32xf32, #tpu.memory_space<vmem>>, vector<1x1x16x32xf32>,
    return
  }
  func.func @transform_0(%arg0: i32, %arg1: i32) -> (i32, i32, i32, i32) {
    %c0_i32 = arith.constant 0 : i32
    %c0_i32_0 = arith.constant 0 : i32
    %c0_i32_1 = arith.constant 0 : i32
    return %arg0, %c0_i32, %arg1, %c0_i32_0 : i32, i32, i32, i32
  }
  func.func @transform_1(%arg0: i32, %arg1: i32) -> (i32, i32, i32, i32) {
    %c0_i32 = arith.constant 0 : i32
    %c0_i32_0 = arith.constant 0 : i32
    %c0_i32_1 = arith.constant 0 : i32
    return %arg0, %c0_i32, %arg1, %c0_i32_0 : i32, i32, i32, i32
  }
  func.func @transform_2(%arg0: i32, %arg1: i32) -> (i32, i32) {
    %c0_i32 = arith.constant 0 : i32
    %c0_i32_0 = arith.constant 0 : i32
    %c0_i32_1 = arith.constant 0 : i32
    return %c0_i32, %c0_i32_0 : i32, i32
  }
  func.func @transform_3(%arg0: i32, %arg1: i32) -> (i32, i32) {
    %c0_i32 = arith.constant 0 : i32
    %c0_i32_0 = arith.constant 0 : i32
    %c0_i32_1 = arith.constant 0 : i32
    return %c0_i32, %c0_i32_0 : i32, i32
  }
  func.func @transform_4(%arg0: i32, %arg1: i32) -> (i32, i32) {
    %c0_i32 = arith.constant 0 : i32
    %c0_i32_0 = arith.constant 0 : i32
    %c0_i32_1 = arith.constant 0 : i32
    return %c0_i32, %c0_i32_0 : i32, i32
  }
  func.func @transform_5(%arg0: i32, %arg1: i32) -> i32 {
    %c0_i32 = arith.constant 0 : i32
    %c0_i32_0 = arith.constant 0 : i32
    return %c0_i32 : i32
  }
  func.func @transform_6(%arg0: i32, %arg1: i32) -> (i32, i32, i32, i32) {
    %c0_i32 = arith.constant 0 : i32
    %c0_i32_0 = arith.constant 0 : i32
    %c0_i32_1 = arith.constant 0 : i32
    return %arg0, %c0_i32, %arg1, %c0_i32_0 : i32, i32, i32, i32
  }
}

</mosaic_0001>

<bundles_post_ra>
// kernel: tpu_custom_call.1
= control target key start
LH: loop header
LB: loop body
LE: loop exit
PB: predicated region body
PF: predicated region fallthrough
CT: control target
= control target key end

     0   :  { %s2126_s0 = inlined_call_operand.hbm [shape: f32[2,4,16,64], index: 0, kind: input, shape index: {}]   ;;  %s2127_s1 = inlined_call_operand.hbm [shape: f32[2,4,16,32], index: 1, kind: input, shape index: {}]   ;;  %s2128_s2 = inlined_call_operand.vmem [shape: f32[1,32], index: 2, kind: input, shape index: {}]   ;;  %s2129_s3 = inlined_call_operand.vmem [shape: f32[1,32], index: 3, kind: input, shape index: {}]   ;;  %s2130_s4 = inlined_call_operand.hbm [shape: f32[4,4], index: 4, kind: input, shape index: {}]   ;;  %s2131_s5 = inlined_call_operand.vmem [shape: f32[4], index: 5, kind: input, shape index: {}]   ;;  %s2132_s6 = inlined_call_operand.hbm [shape: f32[2,4,16,32], index: 6, kind: output, shape index: {}]  }
   0x1   :  { %2138 = sst [smem:[#allocation21_spill]] %s2126_s0 }
   0x2   :  { %2139 = sst [smem:[#allocation22_spill]] %s2130_s4 }
   0x3   :  { %2140 = sst [smem:[#allocation23_spill]] %s2131_s5 }
   0x4   :  { %11 = vsyncpa [#allocation3], 0 }
   0x5   :  { %13 = vsyncpa [#allocation3 + $0x1], 0 }
   0x6   :  { %14 = vsyncpa [#allocation8], 0 }
   0x7   :  { %16 = vsyncpa [#allocation8 + $0x1], 0 }
   0x8   :  { %17 = vsyncpa [#allocation5], 0 }
   0x9   :  { %18 = vsyncpa [#allocation6], 0 }
   0xa   :  { %19 = vsyncpa [#allocation4], 0 }
   0xb   :  { %21 = vsyncpa [#allocation4 + $0x1], 0  ;;  %s1440_s21 = smov 0   ;;  %s1442_s22 = smov 0  }
   0xc   :  { %s1444_s23 = smov 0   ;;  %s1446_s24 = smov 0  }
   0xd   :  { %s1448_s25 = smov 0   ;;  %s1450_s26 = smov 0  }
   0xe LB: > { %2141 = sst [smem:[#allocation17_spill]] %s1391_s25  ;;  %s1049_s27 = sadd.s32 4294967295, %s1395_s26   ;;  %s1395_s26 = sphi %s1450_s26, %s27_s26   ;;  %s1391_s25 = sphi %s1448_s25, %s2170_s25   ;;  %s1387_s24 = sphi %s1446_s24, %s2169_s24   ;;  %s1383_s23 = sphi %s1444_s23, %s2173_s23   ;;  %s1379_s22 = sphi %s1442_s22, %s2172_s22   ;;  %s1375_s21 = sphi %s1440_s21, %s2171_s21  }
   0xf   : > { %2142 = sst [smem:[#allocation18_spill]] %s1395_s26  ;;  %s1050_s28 = sadd.s32 4294967294, %s1395_s26  }
  0x10   : > { %s48_s29 = sadd.s32 1, %s1383_s23  ;;  %p55_p0 = scmp.ne.s32.totalorder %s1383_s23, %s1379_s22 }
  0x11   : > { %p56_p1 = scmp.eq.s32.totalorder %s1395_s26, 0  ;;  %p61_p2 = scmp.ne.s32.totalorder %s1379_s22, %s1375_s21 }
  0x12   : > { %p1478_p3 = scmp.eq.s32.totalorder %s1049_s27, 0  ;;  %p199_p4 = scmp.eq.s32.totalorder %s1049_s27, 1 }
  0x13   : > { %p1482_p5 = por %p56_p1, %p55_p0  ;;  %p205_p6 = scmp.eq.s32.totalorder %s1050_s28, 1 }
  0x14   : > { %p1488_p7 = por %p1478_p3, %p61_p2  ;;  %p1492_p8 = por %p199_p4, %p55_p0 }
  0x15   : > { %p1496_p9 = por %p205_p6, %p61_p2  ;;  %p1051_p10 = scmp.ge.s32.totalorder %s1395_s26, 1 }
  0x16   : > { %p212_p11 = scmp.lt.s32.totalorder %s1395_s26, 3  ;;  %s2149_s4 = sld [smem:[#allocation22_spill]] }
  0x17   : > { %s2147_s10 = scalar_select %p1496_p9, 1, 0 }
  0x18   : > { %p1505_p12 = pnand %p1051_p10, %p212_p11  ;;  %p1054_p13 = scmp.ge.s32.totalorder %s1395_s26, 2 }
  0x19   : > { %2148 = sst [smem:[#allocation19_spill]] %s2147_s10  ;;  %p1133_p0 = scmp.lt.s32.totalorder %s1395_s26, 2 }
  0x1a   : > { %p1113_p1 = pneg %p1505_p12  ;;  %s2151_s5 = sld [smem:[#allocation23_spill]] }
  0x1b   : > { %p1518_p2 = pnand %p1133_p0, %p1482_p5  ;;  %s1397_s19 = smov [#allocation9]  }
  0x1c   : > { %s230_s13 = sshll.u32 %s2149_s4, 4  ;;  %p1114_p4 = pnand %p1113_p1, %p1478_p3  ;;  %s231_s13 = int_to_ptr.hbm [resolvable:$true] %s230_s13 }
  0x1d   : > { %s1398_s20 = smov [#allocation10]   ;;  %s39_s27 = sadd.s32 1, %s1391_s25 }
  0x1e   : > { %1116 = dma.hbm_to_smem (!%p1114_p4), %s231_s13, 64, %s1397_s19, [#allocation5]  }
  0x1f   : > { %s1526_s28 = sand.u32 1, %s1383_s23   ;;  %p41_p6 = scmp.ge.s32.totalorder %s39_s27, 2 }
  0x20   : > { %s240_s17 = sshll.u32 %s2151_s5, 4  ;;  %s1055_s7 = sshll.u32 %s1526_s28, 6  ;;  %s241_s17 = int_to_ptr.vmem [resolvable:$true] %s240_s17 }
  0x21   : > { %1119 = dma.vmem_to_smem (!%p1114_p4), %s241_s17, 16, %s1398_s20, [#allocation6]  }
  0x22   : > { %s1096_s11 = sshll.u32 %s1391_s25, 6  ;;  %s2175_s27 = smov (%p41_p6, %s39_s27), 0 }
  0x23   : > { %2153 = sst [smem:[#allocation20_spill]] %s2175_s27  ;;  %s43_s16 = ssub.s32 %s1391_s25, %s2175_s27 }
  0x24   : > { %s2154_s0 = sld [smem:[#allocation21_spill]]  ;;  %p46_p5 = scmp.eq.s32.totalorder %s43_s16, 0 }
  0x25   : > { %s255_s17 = scalar_lea.vmem [#allocation2], %s1055_s7  ;;  %s252_s5 = scalar_lea.sflag [#allocation3], %s1526_s28 }
  0x26   : > { %s265_s20 = sshll.u32 %s255_s17, 4  ;;  %s1399_s26 = smov 128   ;;  %s266_s20 = int_to_ptr.vmem [resolvable:$true] %s265_s20 }
  0x27   : > { %s1540_s4 = scalar_select %p46_p5, %s1383_s23, %s48_s29  }
  0x28   : > { %s1400_s10 = smov 8   ;;  %s276_s25 = scalar_lea.sflag [#allocation8], %s1526_s28 }
  0x29   : > { %s1554_s29 = sand.u32 (!%p1505_p12), 1, %s1379_s22  }
  0x2a   : > { %s262_s13 = scalar_lea.hbm %s2154_s0, %s1096_s11  ;;  %s286_s0 = scalar_lea.hbm %s2127_s1, %s1096_s11 }
  0x2b   : > { %s263_s19 = sshll.u32 %s262_s13, 4  ;;  %s279_s13 = scalar_lea.vmem [#allocation7], %s1055_s7  ;;  %s264_s19 = int_to_ptr.hbm [resolvable:$true] %s263_s19 }
  0x2c   : > { %1123 = dma.hbm_to_vmem [thread:$0]  (!%p1518_p2), %s264_s19, 1024, %s266_s20, %s252_s5, %s1399_s26, %s1399_s26, %s1400_s10  }
  0x2d   : > { %s289_s16 = sshll.u32 %s279_s13, 4  ;;  %s287_s27 = sshll.u32 %s286_s0, 4  ;;  %s290_s16 = int_to_ptr.vmem [resolvable:$true] %s289_s16  ;;  %s288_s27 = int_to_ptr.hbm [resolvable:$true] %s287_s27 }
  0x2e   : > { %1126 = dma.hbm_to_vmem [thread:$0]  (!%p1518_p2), %s288_s27, 1024, %s290_s16, %s276_s25, %s1399_s26, %s1399_s26, %s1400_s10  }
  0x2f   : > { %301 = sbr.rel (%p1505_p12) target bundleno = 533 (0x215), region = 44  ;;  %s1557_s5 = sshll.u32 (!%p1505_p12), %s1554_s29, 6 }
  0x30   : > { %s304_s7 = scalar_lea.sflag (!%p1505_p12), [#allocation3], %s1554_s29  ;;  %s307_s11 = scalar_lea.vmem (!%p1505_p12), [#allocation2], %s1557_s5 }
  0x34   : > { %1354 = dma.done.wait (%p1488_p7), %s304_s7, 1024  }
  0x35   : > { %1356 = vsyncadd (%p1488_p7), %s304_s7, 4294966272  ;;  %s314_s0 = scalar_lea.sflag [#allocation8], %s1554_s29  ;;  %s1567_s25 = scalar_lea.vmem [#allocation7], %s1557_s5 }
  0x36   : > { %1358 = dma.done.wait (%p1488_p7), %s314_s0, 1024  }
  0x37   : > { %1360 = vsyncadd (%p1488_p7), %s314_s0, 4294966272 }
  0x38   : > { %1362 = dma.done.wait (%p1478_p3), [#allocation5], 64  }
  0x39   : > { %1364 = vsyncadd (%p1478_p3), [#allocation5], 4294967232 }
  0x3a   : > { %1366 = dma.done.wait (%p1478_p3), [#allocation6], 16  }
  0x3b   : > { %1368 = vsyncadd (%p1478_p3), [#allocation6], 4294967280 }
  0x3c   : > { %333 = sfence }
  0x3d   : > { %v1581_v0 = vld [vmem:[%s307_s11 + $0x10] sm:$0xff]  ;;  %v1583_v1 = vld [vmem:[%s307_s11] sm:$0xff]  ;;  %s1401_s26 = smov 96   ;;  %v1593_v3 = vld [vmem:[%s307_s11 + $0x18] sm:$0xff]  ;;  %vm406_vm0 = vcmask 261120   ;;  %s1402_s10 = smov 32  }
  0x3e   : > { %386 = vrot.lane.b32.xlu1 %v1581_v0, %s1401_s26  ;;  %382 = vrot.lane.b32.xlu0 %v1583_v1, %s1401_s26  ;;  %v1589_v2 = vld [vmem:[%s307_s11 + $0x20] sm:$0xff]  ;;  %v1595_v4 = vld [vmem:[%s307_s11 + $0x8] sm:$0xff]  ;;  %v439_v9 = vmul.f32 %v1583_v1, %v1583_v1  ;;  %v442_v10 = vmul.f32 %v1593_v3, %v1593_v3  ;;  %v441_v11 = vmul.f32 %v1581_v0, %v1581_v0  ;;  %s1728_s27 = sld [smem:[#allocation9 + $0x80]] }
  0x3f   : > { %390 = vrot.lane.b32.xlu2 %v1589_v2, %s1401_s26  ;;  %v1601_v5 = vld [vmem:[%s307_s11 + $0x28] sm:$0xff]  ;;  %v1605_v6 = vld [vmem:[%s307_s11 + $0x38] sm:$0xff]  ;;  %v1607_v7 = vld [vmem:[%s307_s11 + $0x30] sm:$0xff]  ;;  %v440_v8 = vmul.f32 %v1595_v4, %v1595_v4  ;;  %v443_v13 = vmul.f32 %v1589_v2, %v1589_v2  ;;  %s1734_s28 = sld [smem:[#allocation9 + $0x81]] }
  0x40   : > { %v444_v12 = vmul.f32 %v1601_v5, %v1601_v5  ;;  %v446_v14 = vmul.f32 %v1605_v6, %v1605_v6  ;;  %v445_v15 = vmul.f32 %v1607_v7, %v1607_v7  ;;  %v1193_v48 = vld [vmem:[%s2128_s2] ss:$0 sm:$0xff]  ;;  %v668_v50 = vld [vmem:[%s1567_s25 + $0x8] sm:$0xff]  ;;  %v669_v51 = vld [vmem:[%s1567_s25 + $0x10] sm:$0xff]  ;;  %s1742_s19 = sld [smem:[#allocation9 + $0x82]] }
  0x41   : > { %v667_v49 = vld [vmem:[%s1567_s25] sm:$0xff]  ;;  %v672_v53 = vld [vmem:[%s1567_s25 + $0x28] sm:$0xff]  ;;  %v674_v55 = vld [vmem:[%s1567_s25 + $0x38] sm:$0xff]  ;;  %s1751_s17 = sld [smem:[#allocation9 + $0x100]] }
  0x42   : > { %v671_v52 = vld [vmem:[%s1567_s25 + $0x20] sm:$0xff]  ;;  %v670_v56 = vld [vmem:[%s1567_s25 + $0x18] sm:$0xff]  ;;  %v673_v57 = vld [vmem:[%s1567_s25 + $0x30] sm:$0xff]  ;;  %s1767_s20 = sld [smem:[#allocation10 + $0x1]] }
  0x43   : > { %v1194_v54 = vld [vmem:[%s2129_s3] ss:$0 sm:$0xff]  ;;  %s1775_s12 = sld [smem:[#allocation10 + $0x2]] }
  0x44   : > { %s1782_s15 = sld [smem:[#allocation9 + $0x101]] }
  0x45   : > { %s1788_s13 = sld [smem:[#allocation9 + $0x83]] }
  0x46   : > { %388 = vrot.lane.b32.xlu1 %v1593_v3, %s1401_s26  ;;  %384 = vrot.lane.b32.xlu0 %v1595_v4, %s1401_s26  ;;  %s1794_s16 = sld [smem:[#allocation9 + $0x102]] }
  0x47   : > { %392 = vrot.lane.b32.xlu2 %v1601_v5, %s1401_s26  ;;  %s1800_s7 = sld [smem:[#allocation9 + $0x103]] }
  0x48   : > { %s1806_s11 = sld [smem:[#allocation9 + $0x180]] }
  0x49   : > { %s1809_s0 = sld [smem:[#allocation10 + $0x3]] }
  0x4a   : > { %s1819_s25 = sld [smem:[#allocation9 + $0x181]] }
  0x4b   : > { %s1830_s30 = sld [smem:[#allocation9]] }
  0x4c   : > { %s1843_s8 = sld [smem:[#allocation10]] }
  0x4d   : > { %s1873_s14 = sld [smem:[#allocation9 + $0x2]] }
  0x4e   : > { %396 = vrot.lane.b32.xlu1 %v1605_v6, %s1401_s26  ;;  %394 = vrot.lane.b32.xlu0 %v1607_v7, %s1401_s26  ;;  %s1887_s18 = sld [smem:[#allocation9 + $0x3]] }
  0x56   : > { %457 = vrot.lane.b32.xlu1 %v440_v8, %s1401_s26  ;;  %455 = vrot.lane.b32.xlu0 %v439_v9, %s1401_s26 }
  0x5e   : > { %461 = vrot.lane.b32.xlu1 %v442_v10, %s1401_s26  ;;  %459 = vrot.lane.b32.xlu0 %v441_v11, %s1401_s26 }
  0x66   : > { %465 = vrot.lane.b32.xlu1 %v444_v12, %s1401_s26  ;;  %463 = vrot.lane.b32.xlu0 %v443_v13, %s1401_s26 }
  0x6e   : > { %469 = vrot.lane.b32.xlu1 %v446_v14, %s1401_s26  ;;  %467 = vrot.lane.b32.xlu0 %v445_v15, %s1401_s26 }
  0x99   : > { %v391_v24 = vpop.permute.xlu2 %390 }
  0x9a   : > { %v419_v25 = vsel %vm406_vm0, %v391_v24, 0.0 }
  0xa1   : > { %v393_v29 = vpop.permute.xlu2 %392 }
  0xa2   : > { %v422_v30 = vsel %vm406_vm0, %v393_v29, 0.0 }
  0xb0   : > { %v387_v16 = vpop.permute.xlu1 %386  ;;  %v383_v17 = vpop.permute.xlu0 %382 }
  0xb1   : > { %v413_v18 = vsel %vm406_vm0, %v387_v16, 0.0  ;;  %v407_v19 = vsel %vm406_vm0, %v383_v17, 0.0 }
  0xb2   : > { %414 = vadd.xlane.f32.xlu1 %v413_v18  ;;  %408 = vadd.xlane.f32.xlu2 %v407_v19 }
  0xb8   : > { %v389_v20 = vpop.permute.xlu1 %388  ;;  %v385_v21 = vpop.permute.xlu0 %384 }
  0xb9   : > { %v416_v22 = vsel %vm406_vm0, %v389_v20, 0.0  ;;  %v410_v23 = vsel %vm406_vm0, %v385_v21, 0.0 }
  0xba   : > { %417 = vadd.xlane.f32.xlu2 %v416_v22  ;;  %411 = vadd.xlane.f32.xlu0 %v410_v23 }
  0xc0   : > { %v397_v26 = vpop.permute.xlu1 %396  ;;  %v395_v27 = vpop.permute.xlu0 %394 }
  0xc1   : > { %v425_v28 = vsel %vm406_vm0, %v395_v27, 0.0  ;;  %v428_v35 = vsel %vm406_vm0, %v397_v26, 0.0 }
  0xc2   : > { %420 = vadd.xlane.f32.xlu2 %v419_v25  ;;  %426 = vadd.xlane.f32.xlu1 %v425_v28 }
  0xc8   : > { %v458_v31 = vpop.permute.xlu1 %457  ;;  %v456_v32 = vpop.permute.xlu0 %455 }
  0xc9   : > { %v479_v40 = vsel %vm406_vm0, %v456_v32, 0.0  ;;  %v482_v43 = vsel %vm406_vm0, %v458_v31, 0.0 }
  0xca   : > { %423 = vadd.xlane.f32.xlu2 %v422_v30 }
  0xd0   : > { %v462_v33 = vpop.permute.xlu1 %461  ;;  %v460_v34 = vpop.permute.xlu0 %459 }
  0xd1   : > { %v488_v36 = vsel %vm406_vm0, %v462_v33, 0.0  ;;  %v485_v45 = vsel %vm406_vm0, %v460_v34, 0.0 }
  0xd2   : > { %429 = vadd.xlane.f32.xlu2 %v428_v35  ;;  %489 = vadd.xlane.f32.xlu0 %v488_v36 }
  0xd8   : > { %v466_v37 = vpop.permute.xlu1 %465  ;;  %v464_v38 = vpop.permute.xlu0 %463 }
  0xd9   : > { %v494_v39 = vsel %vm406_vm0, %v466_v37, 0.0  ;;  %v491_v41 = vsel %vm406_vm0, %v464_v38, 0.0 }
  0xda   : > { %495 = vadd.xlane.f32.xlu1 %v494_v39  ;;  %480 = vadd.xlane.f32.xlu2 %v479_v40 }
  0xdb   : > { %492 = vadd.xlane.f32.xlu0 %v491_v41 }
  0xe0   : > { %v470_v42 = vpop.permute.xlu1 %469  ;;  %v468_v46 = vpop.permute.xlu0 %467 }
  0xe1   : > { %v500_v44 = vsel %vm406_vm0, %v470_v42, 0.0  ;;  %v497_v47 = vsel %vm406_vm0, %v468_v46, 0.0 }
  0xe2   : > { %483 = vadd.xlane.f32.xlu2 %v482_v43 }
  0xe3   : > { %501 = vadd.xlane.f32.xlu0 %v500_v44 }
  0xea   : > { %486 = vadd.xlane.f32.xlu2 %v485_v45 }
  0xf2   : > { %498 = vadd.xlane.f32.xlu2 %v497_v47 }
  0xf3   : > { %642 = vrot.lane.b32.xlu1 %v1193_v48, %s1402_s10 }
  0xf7   : > { %703 = vrot.lane.b32.xlu0 %v667_v49, %s1402_s10 }
  0xfb   : > { %705 = vrot.lane.b32.xlu1 %v668_v50, %s1402_s10 }
  0xff   : > { %757 = vrot.lane.b32.xlu0 %v669_v51, %s1402_s10 }
 0x103   : > { %812 = vrot.lane.b32.xlu1 %v671_v52, %s1402_s10 }
 0x107   : > { %814 = vrot.lane.b32.xlu0 %v672_v53, %s1402_s10 }
 0x10a   : > { %656 = vrot.lane.b32.xlu2 %v1194_v54, %s1402_s10 }
 0x10b   : > { %869 = vrot.lane.b32.xlu1 %v674_v55, %s1402_s10 }
 0x10f   : > { %711 = vrot.lane.b32.xlu0 %v1583_v1, %s1402_s10 }
 0x112   : > { %759 = vrot.lane.b32.xlu2 %v670_v56, %s1402_s10 }
 0x113   : > { %765 = vrot.lane.b32.xlu1 %v1581_v0, %s1402_s10 }
 0x117   : > { %767 = vrot.lane.b32.xlu0 %v1593_v3, %s1402_s10 }
 0x11a   : > { %867 = vrot.lane.b32.xlu2 %v673_v57, %s1402_s10 }
 0x11b   : > { %822 = vrot.lane.b32.xlu1 %v1601_v5, %s1402_s10 }
 0x11f   : > { %875 = vrot.lane.b32.xlu0 %v1607_v7, %s1402_s10 }
 0x122   : > { %713 = vrot.lane.b32.xlu2 %v1595_v4, %s1402_s10 }
 0x125   : > { %v409_v58 = vpop.xlane.xlu2 %408  ;;  %v415_v61 = vpop.xlane.xlu1 %414 }
 0x126   : > { %v1679_v15 = vmul.f32 0.03125, %v409_v58  ;;  %v1719_v54 = vmul.f32 0.03125, %v415_v61 }
 0x128   : > { %v511_v21 = vmul.f32 %v1679_v15, %v1679_v15 }
 0x12a   : > { %820 = vrot.lane.b32.xlu2 %v1589_v2, %s1402_s10 }
 0x12d   : > { %v418_v59 = vpop.xlane.xlu2 %417  ;;  %v412_v62 = vpop.xlane.xlu0 %411 }
 0x12e   : > { %v1675_v8 = vmul.f32 0.03125, %v418_v59  ;;  %v1693_v32 = vmul.f32 0.03125, %v412_v62 }
 0x130   : > { %v514_v13 = vmul.f32 %v1675_v8, %v1675_v8  ;;  %v512_v41 = vmul.f32 %v1693_v32, %v1693_v32 }
 0x132   : > { %877 = vrot.lane.b32.xlu2 %v1605_v6, %s1402_s10  ;;  %s1863_s10 = sld [smem:[#allocation9 + $0x1]] }
 0x135   : > { %v421_v60 = vpop.xlane.xlu2 %420  ;;  %v427_v9 = vpop.xlane.xlu1 %426 }
 0x136   : > { %v1683_v17 = vmul.f32 0.03125, %v421_v60  ;;  %v1736_v61 = vmul.f32 0.03125, %v427_v9  ;;  %v623_v9 = vsub.f32 %v1583_v1, %v1679_v15 }
 0x138   : > { %v515_v26 = vmul.f32 %v1683_v17, %v1683_v17 }
 0x13d   : > { %v424_v63 = vpop.xlane.xlu2 %423 }
 0x13e   : > { %v1681_v16 = vmul.f32 0.03125, %v424_v63 }
 0x140   : > { %v516_v22 = vmul.f32 %v1681_v16, %v1681_v16 }
 0x145   : > { %v430_v10 = vpop.xlane.xlu2 %429  ;;  %v490_v11 = vpop.xlane.xlu0 %489 }
 0x146   : > { %v506_v12 = vmul.f32 0.03125, %v490_v11  ;;  %v1695_v35 = vmul.f32 0.03125, %v430_v10  ;;  %v513_v10 = vmul.f32 %v1719_v54, %v1719_v54 }
 0x148   : > { %v522_v14 = vsub.f32 %v506_v12, %v514_v13  ;;  %v518_v44 = vmul.f32 %v1695_v35, %v1695_v35  ;;  %v625_v13 = vsub.f32 %v1581_v0, %v1719_v54 }
 0x14a   : > { %v530_v18 = vmax.f32 %v522_v14, 0.0 }
 0x14c   : > { %v1691_v30 = vadd.f32 1e-05, %v530_v18  ;;  %v626_v18 = vsub.f32 %v1593_v3, %v1675_v8 }
 0x14d   : > { %v496_v19 = vpop.xlane.xlu1 %495  ;;  %v481_v20 = vpop.xlane.xlu2 %480 }
 0x14e   : > { %v508_v23 = vmul.f32 0.03125, %v496_v19  ;;  %v503_v24 = vmul.f32 0.03125, %v481_v20  ;;  %v493_v25 = vpop.xlane.xlu0 %492  ;;  %1195 = vrsqrt.f32 %v1691_v30  ;;  %v624_v19 = vsub.f32 %v1595_v4, %v1693_v32 }
 0x14f   : > { %v507_v27 = vmul.f32 0.03125, %v493_v25  ;;  %v629_v25 = vsub.f32 %v1607_v7, %v1736_v61  ;;  %vm579_vm2 = vweird.f32 %v1691_v30  ;;  %v750_v4 = vstv %s1788_s13 }
 0x150   : > { %v524_v28 = vsub.f32 %v508_v23, %v516_v22  ;;  %v519_v29 = vsub.f32 %v503_v24, %v511_v21  ;;  %v627_v23 = vsub.f32 %v1589_v2, %v1683_v17  ;;  %v517_v24 = vmul.f32 %v1736_v61, %v1736_v61 }
 0x151   : > { %v523_v31 = vsub.f32 %v507_v27, %v515_v26  ;;  %v628_v27 = vsub.f32 %v1601_v5, %v1681_v16  ;;  %v789_v32 = vstv %s1775_s12  ;;  %v684_v16 = vstv %s1863_s10 }
 0x152   : > { %v532_v33 = vmax.f32 %v524_v28, 0.0  ;;  %v527_v34 = vmax.f32 %v519_v29, 0.0 }
 0x153   : > { %v531_v36 = vmax.f32 %v523_v31, 0.0 }
 0x154   : > { %v1697_v37 = vadd.f32 1e-05, %v532_v33  ;;  %v1699_v38 = vadd.f32 1e-05, %v527_v34  ;;  %v1711_v49 = vpop.eup %1195 }
 0x155   : > { %v1702_v39 = vadd.f32 1e-05, %v531_v36  ;;  %v484_v40 = vpop.xlane.xlu2 %483  ;;  %v574_v62 = vmul.f32 %v1711_v49, %v1691_v30  ;;  %vm580_vm8 = vweird.f32 %v1711_v49 }
 0x156   : > { %1197 = vrsqrt.f32 %v1697_v37  ;;  %v504_v42 = vmul.f32 0.03125, %v484_v40  ;;  %v502_v43 = vpop.xlane.xlu0 %501  ;;  %v630_v40 = vsub.f32 %v1605_v6, %v1695_v35  ;;  %vm549_vm3 = vweird.f32 %v1699_v38 }
 0x157   : > { %1199 = vrsqrt.f32 %v1699_v38  ;;  %v510_v45 = vmul.f32 0.03125, %v502_v43  ;;  %v575_v26 = vmul.f32 %v1711_v49, %v574_v62  ;;  %v730_v43 = vstv %s1728_s27  ;;  %s1996_s27 = sld [smem:[#allocation9 + $0x182]] }
 0x158   : > { %1201 = vrsqrt.f32 %v1702_v39  ;;  %v520_v46 = vsub.f32 %v504_v42, %v512_v41  ;;  %vm599_vm9 = vweird.f32 %v1697_v37  ;;  %vm589_vm12 = vweird.f32 %v1702_v39 }
 0x159   : > { %v526_v47 = vsub.f32 %v510_v45, %v518_v44  ;;  %v696_v6 = vstv %s1887_s18 }
 0x15a   : > { %v528_v48 = vmax.f32 %v520_v46, 0.0 }
 0x15b   : > { %v534_v50 = vmax.f32 %v526_v47, 0.0  ;;  %v738_v47 = vstv %s1734_s28  ;;  %s362_s28 = scalar_lea.vmem [#allocation11], %s1557_s5 }
 0x15c   : > { %v1713_v51 = vpop.eup %1197  ;;  %v1715_v52 = vadd.f32 1e-05, %v528_v48  ;;  %v576_v48 = vmul.f32 0.5, %v575_v26  ;;  %s909_s12 = sshll.u32 %s362_s28, 4  ;;  %s910_s12 = int_to_ptr.vmem [resolvable:$true] %s909_s12 }
 0x15d   : > { %v1717_v53 = vpop.eup %1199  ;;  %v1721_v55 = vadd.f32 1e-05, %v534_v50  ;;  %v487_v56 = vpop.xlane.xlu2 %486  ;;  %v594_v59 = vmul.f32 %v1713_v51, %v1697_v37  ;;  %vm600_vm11 = vweird.f32 %v1713_v51 }
 0x15e   : > { %v1723_v57 = vpop.eup %1201  ;;  %v544_v58 = vmul.f32 %v1717_v53, %v1699_v38  ;;  %1203 = vrsqrt.f32 %v1715_v52  ;;  %v505_v12 = vmul.f32 0.03125, %v487_v56  ;;  %vm550_vm1 = vweird.f32 %v1717_v53  ;;  %vm1879_vm15 = vmor %vm599_vm9, %vm600_vm11 }
 0x15f   : > { %v584_v60 = vmul.f32 %v1723_v57, %v1702_v39  ;;  %1205 = vrsqrt.f32 %v1721_v55  ;;  %v595_v20 = vmul.f32 %v1713_v51, %v594_v59  ;;  %v744_v56 = vstv %s1742_s19  ;;  %vm1813_vm5 = vmor %vm549_vm3, %vm550_vm1  ;;  %s1098_s19 = sshll.u32 %s1387_s24, 6  ;;  %s895_s24 = scalar_lea.sflag [#allocation4], %s1554_s29 }
 0x160   : > { %v545_v63 = vmul.f32 %v1717_v53, %v544_v58  ;;  %v521_v21 = vsub.f32 %v505_v12, %v513_v10  ;;  %vm590_vm6 = vweird.f32 %v1723_v57  ;;  %vm559_vm7 = vweird.f32 %v1715_v52  ;;  %vm1893_vm1 = vmor %vm579_vm2, %vm580_vm8  ;;  %s908_s5 = scalar_lea.hbm %s2132_s6, %s1098_s19 }
 0x161   : > { %v585_v11 = vmul.f32 %v1723_v57, %v584_v60  ;;  %v596_v44 = vmul.f32 0.5, %v595_v20  ;;  %vm1857_vm13 = vmor %vm589_vm12, %vm590_vm6  ;;  %vm619_vm3 = vweird.f32 %v1721_v55 }
 0x162   : > { %v546_v14 = vmul.f32 0.5, %v545_v63  ;;  %v529_v41 = vmax.f32 %v521_v21, 0.0  ;;  %v577_v21 = vsub.f32 1.5, %v576_v48 }
 0x163   : > { %v586_v29 = vmul.f32 0.5, %v585_v11  ;;  %v785_v11 = vstv %s1751_s17  ;;  %v597_v12 = vsub.f32 1.5, %v596_v44  ;;  %s2018_s17 = sld [smem:[#allocation9 + $0x183]] }
 0x164   : > { %v1758_v22 = vpop.eup %1203  ;;  %v547_v28 = vsub.f32 1.5, %v546_v14  ;;  %v1791_v50 = vadd.f32 1e-05, %v529_v41  ;;  %v578_v48 = vmul.f32 %v1711_v49, %v577_v21 }
 0x165   : > { %v554_v31 = vmul.f32 %v1758_v22, %v1715_v52  ;;  %v1773_v33 = vpop.permute.xlu1 %642  ;;  %v499_v34 = vpop.xlane.xlu2 %498  ;;  %v587_v59 = vsub.f32 1.5, %v586_v29  ;;  %vm560_vm4 = vweird.f32 %v1758_v22  ;;  %v598_v44 = vmul.f32 %v1713_v51, %v597_v12 }
 0x166   : > { %v1777_v36 = vpop.eup %1205  ;;  %v509_v42 = vmul.f32 0.03125, %v499_v34  ;;  %v548_v58 = vmul.f32 %v1717_v53, %v547_v28  ;;  %1207 = vrsqrt.f32 %v1791_v50  ;;  %vm1836_vm10 = vmor %vm559_vm7, %vm560_vm4  ;;  %v805_v12 = vstv %s1800_s7 }
 0x167   : > { %v555_v45 = vmul.f32 %v1758_v22, %v554_v31  ;;  %v614_v46 = vmul.f32 %v1777_v36, %v1721_v55  ;;  %v588_v28 = vmul.f32 %v1723_v57, %v587_v59  ;;  %vm620_vm14 = vweird.f32 %v1777_v36 }
 0x168   : > { %v525_v10 = vsub.f32 %v509_v42, %v517_v24  ;;  %v552_v24 = vsel %vm1813_vm5, %v1717_v53, %v548_v58  ;;  %v793_v42 = vstv %s1782_s15  ;;  %v602_v37 = vsel %vm1879_vm15, %v1713_v51, %v598_v44  ;;  %vm1912_vm2 = vmor %vm619_vm3, %vm620_vm14  ;;  %s911_s15 = sshll.u32 %s908_s5, 4  ;;  %s912_s15 = int_to_ptr.hbm [resolvable:$true] %s911_s15 }
 0x169   : > { %v556_v60 = vmul.f32 0.5, %v555_v45  ;;  %v615_v62 = vmul.f32 %v1777_v36, %v614_v46  ;;  %v1798_v63 = vpop.permute.xlu0 %703  ;;  %v631_v58 = vmul.f32 %v623_v9, %v552_v24  ;;  %v592_v39 = vsel %vm1857_vm13, %v1723_v57, %v588_v28  ;;  %s1315_s13 = sshra.s32 %s912_s15, 4  ;;  %s1316_s13 = int_to_ptr.hbm [resolvable:$true] %s1315_s13 }
 0x16a   : > { %v533_v38 = vmax.f32 %v525_v10, 0.0  ;;  %v734_v57 = vstv %s1767_s20  ;;  %v582_v30 = vsel %vm1893_vm1, %v1711_v49, %v578_v48  ;;  %v840_v55 = vstv %s1806_s11  ;;  %p1322_p11 = scmp.lt.s32.totalorder %s1316_s13, %s2132_s6 }
 0x16b   : > { %v557_v14 = vsub.f32 1.5, %v556_v60  ;;  %v616_v20 = vmul.f32 0.5, %v615_v62  ;;  %v636_v24 = vmul.f32 %v628_v27, %v602_v37  ;;  %v848_v28 = vstv %s1819_s25 }
 0x16c   : > { %v1840_v53 = vadd.f32 1e-05, %v533_v38  ;;  %v1208_v46 = vpop.eup %1207  ;;  %v645_v38 = vmul.f32 %v1773_v33, %v631_v58  ;;  %vm569_vm5 = vweird.f32 %v1791_v50 }
 0x16d   : > { %v558_v29 = vmul.f32 %v1758_v22, %v557_v14  ;;  %v617_v31 = vsub.f32 1.5, %v616_v20  ;;  %v1826_v34 = vpop.permute.xlu1 %705  ;;  %v1828_v41 = vpop.permute.xlu2 %656  ;;  %v564_v9 = vmul.f32 %v1208_v46, %v1791_v50  ;;  %v635_v14 = vmul.f32 %v627_v23, %v592_v39 }
 0x16e   : > { %1209 = vrsqrt.f32 %v1840_v53  ;;  %v844_v20 = vstv %s1809_s0  ;;  %vm570_vm4 = vweird.f32 %v1208_v46  ;;  %v1935_v44 = vadd.f32 %v1828_v41, %v645_v38  ;;  %s1321_s0 = scalar_lea.hbm %s2132_s6, 128 }
 0x16f   : > { %v562_v45 = vsel %vm1836_vm10, %v1758_v22, %v558_v29  ;;  %v618_v15 = vmul.f32 %v1777_v36, %v617_v31  ;;  %v565_v62 = vmul.f32 %v1208_v46, %v564_v9  ;;  %v676_v29 = vstv %s1830_s30  ;;  %vm571_vm6 = vmor %vm569_vm5, %vm570_vm4 }
 0x170   : > { %v632_v1 = vmul.f32 %v624_v19, %v562_v45  ;;  %v799_v19 = vstv %s1794_s16  ;;  %v680_v31 = vstv %s1843_s8  ;;  %v634_v45 = vmul.f32 %v626_v18, %v582_v30  ;;  %s1317_s16 = scalar_lea.hbm %s1316_s13, 64 }
 0x171   : > { %v1901_v10 = vpop.permute.xlu0 %757  ;;  %v622_v21 = vsel %vm1912_vm2, %v1777_v36, %v618_v15  ;;  %v566_v26 = vmul.f32 0.5, %v565_v62  ;;  %v649_v58 = vmul.f32 %v1773_v33, %v635_v14  ;;  %v650_v3 = vmul.f32 %v1773_v33, %v636_v24  ;;  %p1318_p3 = scmp.ne.s32.totalorder %s1316_s13, %s1317_s16  ;;  %p1323_p12 = scmp.lt.s32.totalorder %s1321_s0, %s1317_s16 }
 0x172   : > { %v646_v49 = vmul.f32 %v1773_v33, %v632_v1  ;;  %v638_v5 = vmul.f32 %v630_v40, %v622_v21  ;;  %v648_v8 = vmul.f32 %v1773_v33, %v634_v45  ;;  %v690_v18 = vstv %s1873_s14 }
 0x173   : > { %v567_v36 = vsub.f32 1.5, %v566_v26  ;;  %v1952_v50 = vadd.f32 %v1828_v41, %v649_v58  ;;  %v731_v39 = vmul.f32 %v730_v43, %v1935_v44  ;;  %v786_v15 = vmul.f32 %v785_v11, %v1935_v44  ;;  %p1319_p7 = pnand %p1318_p3, %p1492_p8  ;;  %p1324_p0 = por %p1323_p12, %p1322_p11 }
 0x174   : > { %v1210_v23 = vpop.eup %1209  ;;  %v660_v59 = vadd.f32 %v1828_v41, %v646_v49  ;;  %v1964_v9 = vadd.f32 %v1828_v41, %v650_v3  ;;  %v662_v60 = vadd.f32 %v1828_v41, %v648_v8  ;;  %vm609_vm8 = vweird.f32 %v1840_v53 }
 0x175   : > { %v1923_v2 = vpop.permute.xlu1 %812  ;;  %v1925_v17 = vpop.permute.xlu2 %759  ;;  %v604_v52 = vmul.f32 %v1210_v23, %v1840_v53  ;;  %v568_v27 = vmul.f32 %v1208_v46, %v567_v36  ;;  %vm610_vm7 = vweird.f32 %v1210_v23  ;;  %v735_v51 = vadd.f32 %v734_v57, %v731_v39  ;;  %p1320_p10 = pneg %p1319_p7 }
 0x176   : > { %v732_v37 = vmul.f32 %v730_v43, %v660_v59  ;;  %v678_v30 = vmul.f32 %v676_v29, %v660_v59  ;;  %v745_v43 = vmul.f32 %v744_v56, %v1952_v50  ;;  %v677_v26 = vmul.f32 %v676_v29, %v1935_v44  ;;  %vm611_vm9 = vmor %vm609_vm8, %vm610_vm7 }
 0x177   : > { %v605_v48 = vmul.f32 %v1210_v23, %v604_v52  ;;  %v572_v35 = vsel %vm571_vm6, %v1208_v46, %v568_v27  ;;  %v652_v46 = vmul.f32 %v1773_v33, %v638_v5  ;;  %v842_v52 = vmul.f32 %v840_v55, %v660_v59  ;;  %p1325_p1 = pnand %p1324_p0, %p1320_p10 }
 0x178   : > { %v633_v1 = vmul.f32 %v625_v13, %v572_v35  ;;  %v787_v13 = vmul.f32 %v785_v11, %v660_v59  ;;  %v790_v11 = vadd.f32 %v789_v32, %v786_v15  ;;  %v682_v49 = vadd.f32 %v680_v31, %v678_v30 }
 0x179   : > { %v606_v40 = vmul.f32 0.5, %v605_v48  ;;  %v1970_v62 = vpop.permute.xlu0 %814  ;;  %v1992_v38 = vadd.f32 %v1828_v41, %v652_v46  ;;  %v736_v36 = vadd.f32 %v734_v57, %v732_v37  ;;  %v686_v29 = vmul.f32 %v684_v16, %v662_v60 }
 0x17a   : > { %v647_v54 = vmul.f32 %v1773_v33, %v633_v1  ;;  %v681_v57 = vadd.f32 %v680_v31, %v677_v26  ;;  %v692_v58 = vmul.f32 %v690_v18, %v1964_v9  ;;  %v795_v3 = vmul.f32 %v793_v42, %v662_v60 }
 0x17b   : > { %v607_v22 = vsub.f32 1.5, %v606_v40  ;;  %v688_v59 = vadd.f32 %v686_v29, %v682_v49  ;;  %v691_v40 = vmul.f32 %v690_v18, %v1952_v50  ;;  %v850_v18 = vmul.f32 %v848_v28, %v662_v60 }
 0x17c   : > { %v1987_v53 = vadd.f32 %v1828_v41, %v647_v54  ;;  %v801_v49 = vmul.f32 %v799_v19, %v1964_v9 }
 0x17d   : > { %v1972_v0 = vpop.permute.xlu2 %867  ;;  %v608_v14 = vmul.f32 %v1210_v23, %v607_v22  ;;  %v1983_v21 = vpop.permute.xlu1 %869  ;;  %v694_v35 = vadd.f32 %v692_v58, %v688_v59 }
 0x17e   : > { %v739_v5 = vmul.f32 %v738_v47, %v1987_v53  ;;  %v794_v27 = vmul.f32 %v793_v42, %v1987_v53  ;;  %v685_v48 = vmul.f32 %v684_v16, %v1987_v53  ;;  %v698_v16 = vmul.f32 %v696_v6, %v1992_v38 }
 0x17f   : > { %v612_v24 = vsel %vm611_vm9, %v1210_v23, %v608_v14  ;;  %v791_v23 = vadd.f32 %v789_v32, %v787_v13  ;;  %v846_v42 = vadd.f32 %v844_v20, %v842_v52  ;;  %v854_v14 = vstv %s1996_s27 }
 0x180   : > { %v637_v45 = vmul.f32 %v629_v25, %v612_v24  ;;  %v741_v61 = vadd.f32 %v739_v5, %v735_v51  ;;  %v740_v25 = vmul.f32 %v738_v47, %v662_v60  ;;  %v796_v8 = vadd.f32 %v794_v27, %v790_v11 }
 0x181   : > { %v687_v32 = vadd.f32 %v685_v48, %v681_v57  ;;  %v800_v47 = vmul.f32 %v799_v19, %v1952_v50  ;;  %v797_v15 = vadd.f32 %v795_v3, %v791_v23  ;;  %v712_v46 = vpop.permute.xlu0 %711  ;;  %v700_v22 = vadd.f32 %v698_v16, %v694_v35 }
 0x182   : > { %v651_v7 = vmul.f32 %v1773_v33, %v637_v45  ;;  %v747_v39 = vadd.f32 %v745_v43, %v741_v61  ;;  %v742_v1 = vadd.f32 %v740_v25, %v736_v36  ;;  %v746_v11 = vmul.f32 %v744_v56, %v1964_v9 }
 0x183   : > { %v802_v30 = vadd.f32 %v800_v47, %v796_v8  ;;  %v710_v43 = vadd.f32 %v1826_v34, %v700_v22  ;;  %v852_v36 = vadd.f32 %v850_v18, %v846_v42  ;;  %v841_v52 = vmul.f32 %v840_v55, %v1935_v44 }
 0x184   : > { %v665_v33 = vadd.f32 %v1828_v41, %v651_v7  ;;  %v693_v41 = vadd.f32 %v691_v40, %v687_v32  ;;  %v748_v45 = vadd.f32 %v746_v11, %v742_v1  ;;  %v803_v34 = vadd.f32 %v801_v49, %v797_v15 }
 0x185   : > { %v714_v31 = vpop.permute.xlu2 %713  ;;  %v766_v51 = vpop.permute.xlu1 %765  ;;  %v752_v56 = vmul.f32 %v750_v4, %v1992_v38  ;;  %v860_v27 = vstv %s2018_s17  ;;  %v856_v19 = vmul.f32 %v854_v14, %v1964_v9  ;;  %v807_v55 = vmul.f32 %v805_v12, %v1992_v38 }
 0x186   : > { %v751_v37 = vmul.f32 %v750_v4, %v665_v33  ;;  %v806_v54 = vmul.f32 %v805_v12, %v665_v33  ;;  %v697_v13 = vmul.f32 %v696_v6, %v665_v33  ;;  %v718_v60 = vmul.f32 %v714_v31, %v710_v43 }
 0x187   : > { %v754_v58 = vadd.f32 %v752_v56, %v748_v45  ;;  %v809_v59 = vadd.f32 %v807_v55, %v803_v34  ;;  %v845_v4 = vadd.f32 %v844_v20, %v841_v52  ;;  %v862_v9 = vmul.f32 %v860_v27, %v1992_v38 }
 0x188   : > { %v753_v26 = vadd.f32 %v751_v37, %v747_v39  ;;  %v699_v24 = vadd.f32 %v697_v13, %v693_v41  ;;  %v808_v6 = vadd.f32 %v806_v54, %v802_v30  ;;  %723 = vrot.lane.b32.xlu0 %v718_v60, %s1401_s26  ;;  %v861_v3 = vmul.f32 %v860_v27, %v665_v33 }
 0x189   : > { %v768_v7 = vpop.permute.xlu0 %767  ;;  %v855_v8 = vmul.f32 %v854_v14, %v1952_v50 }
 0x18a   : > { %v763_v29 = vadd.f32 %v1901_v10, %v753_v26  ;;  %v709_v5 = vadd.f32 %v1798_v63, %v699_v24  ;;  %v849_v10 = vmul.f32 %v848_v28, %v1987_v53  ;;  %v818_v48 = vadd.f32 %v1923_v2, %v808_v6 }
 0x18b   : > { %v858_v63 = vadd.f32 %v856_v19, %v852_v36  ;;  %v764_v53 = vadd.f32 %v1925_v17, %v754_v58  ;;  %v819_v2 = vadd.f32 %v1970_v62, %v809_v59 }
 0x18c   : > { %v717_v44 = vmul.f32 %v712_v46, %v709_v5  ;;  %v771_v57 = vmul.f32 %v766_v51, %v763_v29  ;;  %v851_v61 = vadd.f32 %v849_v10, %v845_v4 }
 0x18d   : > { %v821_v23 = vpop.permute.xlu2 %820  ;;  %v864_v25 = vadd.f32 %v862_v9, %v858_v63  ;;  %v823_v28 = vpop.permute.xlu1 %822  ;;  %v772_v32 = vmul.f32 %v768_v7, %v764_v53 }
 0x18e   : > { %775 = vrot.lane.b32.xlu2 %v771_v57, %s1401_s26  ;;  %721 = vrot.lane.b32.xlu1 %v717_v44, %s1401_s26  ;;  %v826_v12 = vmul.f32 %v821_v23, %v818_v48  ;;  %v857_v20 = vadd.f32 %v855_v8, %v851_v61  ;;  %v827_v31 = vmul.f32 %v823_v28, %v819_v2 }
 0x18f   : > { %v874_v38 = vadd.f32 %v1983_v21, %v864_v25 }
 0x190   : > { %830 = vrot.lane.b32.xlu0 %v826_v12, %s1401_s26  ;;  %v863_v16 = vadd.f32 %v861_v3, %v857_v20 }
 0x191   : > { %v876_v62 = vpop.permute.xlu0 %875 }
 0x192   : > { %v873_v33 = vadd.f32 %v1972_v0, %v863_v16 }
 0x194   : > { %v881_v50 = vmul.f32 %v876_v62, %v873_v33 }
 0x195   : > { %v878_v35 = vpop.permute.xlu2 %877 }
 0x196   : > { %832 = vrot.lane.b32.xlu2 %v827_v31, %s1401_s26  ;;  %777 = vrot.lane.b32.xlu1 %v772_v32, %s1401_s26  ;;  %v882_v17 = vmul.f32 %v878_v35, %v874_v38 }
 0x198   : > { %887 = vrot.lane.b32.xlu0 %v882_v17, %s1401_s26 }
 0x19e   : > { %885 = vrot.lane.b32.xlu1 %v881_v50, %s1401_s26 }
 0x1e8   : > { %v776_v47 = vpop.permute.xlu2 %775 }
 0x1e9   : > { %1075 = vst.msk [vmem:[%s362_s28 + $0x10] sm:$0xff] %vm406_vm0, %v776_v47 }
 0x1f0   : > { %v833_v21 = vpop.permute.xlu2 %832 }
 0x1f1   : > { %1083 = vst.msk [vmem:[%s362_s28 + $0x28] sm:$0xff] %vm406_vm0, %v833_v21 }
 0x1fa   : > { %v724_v42 = vpop.permute.xlu0 %723 }
 0x1fb   : > { %728 = vst.msk [vmem:[%s362_s28 + $0x8] sm:$0xff] %vm406_vm0, %v724_v42 }
 0x200   : > { %v722_v40 = vpop.permute.xlu1 %721 }
 0x201   : > { %727 = vst.msk [vmem:[%s362_s28] sm:$0xff] %vm406_vm0, %v722_v40 }
 0x202   : > { %v831_v0 = vpop.permute.xlu0 %830 }
 0x203   : > { %1082 = vst.msk [vmem:[%s362_s28 + $0x20] sm:$0xff] %vm406_vm0, %v831_v0 }
 0x208   : > { %v778_v39 = vpop.permute.xlu1 %777 }
 0x209   : > { %1076 = vst.msk [vmem:[%s362_s28 + $0x18] sm:$0xff] %vm406_vm0, %v778_v39 }
 0x20a   : > { %v888_v1 = vpop.permute.xlu0 %887 }
 0x20b   : > { %1090 = vst.msk [vmem:[%s362_s28 + $0x38] sm:$0xff] %vm406_vm0, %v888_v1 }
 0x210   : > { %v886_v15 = vpop.permute.xlu1 %885 }
 0x211   : > { %1089 = vst.msk [vmem:[%s362_s28 + $0x30] sm:$0xff] %vm406_vm0, %v886_v15 }
 0x212   : > { %1328 = shalt.err (!%p1325_p1)
}
 0x213   : > { %s1403_s29 = smov 128   ;;  %s1404_s8 = smov 8  }
 0x214   : > { %1111 = dma.vmem_to_hbm [thread:$0]  (%p1492_p8), %s910_s12, 1024, %s912_s15, %s895_s24, %s1403_s29, %s1403_s29, %s1404_s8  }
 0x215 PF: > { %s2168_s14 = sld [smem:[#allocation18_spill]]  ;;  %s926_s18 = sand.u32 1, %s1375_s21  }
 0x216   : > { %p1128_p2 = pnand %p1054_p13, %p1496_p9  ;;  %s927_s27 = scalar_lea.sflag [#allocation4], %s926_s18 }
 0x218   : > { %p1129_p4 = pneg %p1128_p2 }
 0x21a   : > { %1370 = dma.done.wait (%p1129_p4), %s927_s27, 1024  }
 0x21b   : > { %1372 = vsyncadd (%p1129_p4), %s927_s27, 4294966272  ;;  %s27_s26 = sadd.s32 1, %s2168_s14   ;;  %s2169_s24 = sld [smem:[#allocation17_spill]] }
 0x21c   : > { %p24_p6 = scmp.ge.s32.totalorder %s27_s26, 4   ;;  %s2170_s25 = sld [smem:[#allocation20_spill]] }
 0x21d   : > { %s2171_s21 = smov %s1379_s22  ;;  %s2172_s22 = smov %s1383_s23 }
 0x21e   : > { %s2173_s23 = smov %s1540_s4  ;;  %26 = sbr.rel (!%p24_p6) target bundleno = 14 (0xe), region = 115 }
 0x223   :  { %933 = vsyncpa [#allocation3], 1 }
 0x224   :  { %935 = vsyncpa [#allocation3 + $0x1], 1 }
 0x225   :  { %936 = vsyncpa [#allocation8], 1 }
 0x226   :  { %938 = vsyncpa [#allocation8 + $0x1], 1 }
 0x227   :  { %939 = vsyncpa [#allocation4], 1 }
 0x228   :  { %941 = vsyncpa [#allocation4 + $0x1], 1 }
 0x229   :  { %942 = vsyncpa [#allocation5], 1 }
 0x22a   :  { %944 = vsyncpa [#allocation5 + $0x1], 1 }
 0x22b   :  { %945 = vsyncpa [#allocation6], 1 }
 0x22c   :  { %947 = vsyncpa [#allocation6 + $0x1], 1 }

</bundles_post_ra>
